<compile_context>
chip_gen: v7x
topology: tpu7x:2x2x1
jax: 0.10.0
libtpu: 0.0.40
codegen_flags: <defaults>
</compile_context>

<pallas_src>
import functools

import jax
import jax.numpy as jnp
from jax.experimental import pallas as pl
from jax.experimental.pallas import tpu as pltpu


def _custom_loss_kernel(pred_ref, tgt_ref, out_ref, *, alpha, batch, n, block_b):
    i = pl.program_id(0)

    o = pred_ref[...].astype(jnp.float32)
    t = tgt_ref[...].astype(jnp.float32)

    ragged = (batch % block_b) != 0  # static Python bool
    if ragged:
        row = jax.lax.broadcasted_iota(jnp.int32, o.shape, 0) + i * block_b
        row_ok = row < batch

    # --- squared error (per-lane VPU work; divide by B*N once in the wrapper) ---
    diff = o - t
    val = diff * diff
    if ragged:
        val = jnp.where(row_ok, val, 0.0)

    # --- second-difference penalty, folded into the same reduction ---
    if alpha:  # static trace-time decision, matching PyTorch's `if self.alpha:`
        # Lane-aligned rotations (XLU): o1[:, j] = o[:, j+1], o2[:, j] = o[:, j+2] (mod n)
        o1 = pltpu.roll(o, shift=n - 1, axis=1)
        o2 = pltpu.roll(o, shift=n - 2, axis=1)
        d2 = o + o2 - 2.0 * o1
        lane = jax.lax.broadcasted_iota(jnp.int32, o.shape, 1)
        ok = lane < (n - 2)  # drop the two wrapped lanes
        if ragged:
            ok = jnp.logical_and(ok, row_ok)
        # Pre-scale so loss = sum(val) / (B*N) reproduces mse + alpha * mean(d2^2).
        c = alpha * float(n) / float(n - 2)
        val = val + c * jnp.where(ok, d2 * d2, 0.0)

    partial = jnp.sum(val)  # single reduction per block
    out_ref[...] = jnp.broadcast_to(partial, out_ref.shape).astype(jnp.float32)


def _pick_block_b(batch, n, itemsize):
    # Keep 2 inputs x 2 pipeline buffers of (block_b, n) under ~8 MiB so the same
    # tiling fits v5e's 16 MiB and v7x's 32 MiB scoped-VMEM defaults with headroom.
    budget_bytes = 8 * 1024 * 1024
    max_rows = budget_bytes // (4 * n * itemsize)
    max_rows = min(max_rows, 2048)   # larger tiles add nothing (>~85% of HBM roofline)
    if max_rows < 8:
        # TODO(synk): for huge N, tile the N axis with a 2-column halo instead.
        max_rows = 8
    if batch <= max_rows:
        return batch                 # single block; block dim == full dim is allowed
    return (max_rows // 8) * 8       # multiple of 8 sublanes


def _reference_loss(output, target, alpha):
    """Pure-JAX reference reproducing the PyTorch forward pass (f32 accumulation)."""
    output = output.astype(jnp.float32)
    target = target.astype(jnp.float32)
    loss = jnp.mean((output - target) ** 2)
    if alpha:
        d2 = output[:, :-2] + output[:, 2:] - 2.0 * output[:, 1:-1]
        loss = loss + jnp.mean(d2 ** 2) * alpha
    return loss


def custom_nn_loss(output, target, alpha, *, block_b=None):
    """output/target: (B, N) float arrays (f32 or bf16). Returns scalar f32 loss."""
    assert output.shape == target.shape and output.ndim == 2
    batch, n = output.shape
    alpha = float(alpha)

    # Tiny inputs: pallas_call launch overhead dominates -> let XLA fuse it.
    if block_b is None and (batch * n < 8 * 128 or n < 3):
        return _reference_loss(output, target, alpha)

    if block_b is None:
        itemsize = max(jnp.dtype(output.dtype).itemsize,
                       jnp.dtype(target.dtype).itemsize)
        block_b = _pick_block_b(batch, n, itemsize)

    num_blocks = pl.cdiv(batch, block_b)
    kernel = functools.partial(_custom_loss_kernel, alpha=alpha,
                               batch=batch, n=n, block_b=block_b)

    partials = pl.pallas_call(
        kernel,
        out_shape=jax.ShapeDtypeStruct((num_blocks, 8, 128), jnp.float32),
        grid_spec=pltpu.PrefetchScalarGridSpec(
            num_scalar_prefetch=0,
            grid=(num_blocks,),
            in_specs=[
                pl.BlockSpec((block_b, n), lambda i: (i, 0)),
                pl.BlockSpec((block_b, n), lambda i: (i, 0)),
            ],
            out_specs=pl.BlockSpec((1, 8, 128), lambda i: (i, 0, 0)),
        ),
        compiler_params=pltpu.CompilerParams(
            # No cross-iteration state -> grid axis is truly parallel; on v7x this
            # shards blocks across both TensorCores (2x HBM BW for a mem-bound kernel).
            dimension_semantics=("parallel",),
            vmem_limit_bytes=32 * 1024 * 1024,
        ),
    )(output, target)

    # Tiny wrapper-side reduce over per-block partials + the single final scale.
    total = jnp.sum(partials[:, 0, 0])
    return total * (1.0 / float(batch * n))


if __name__ == "__main__":
    key = jax.random.PRNGKey(0)
    k1, k2, k3, k4, k5, k6 = jax.random.split(key, 6)

    def check(pred, tgt, alpha, **kw):
        got = jax.block_until_ready(custom_nn_loss(pred, tgt, alpha, **kw))
        want = jax.block_until_ready(_reference_loss(pred, tgt, alpha))
        assert jnp.allclose(got, want, rtol=1e-5, atol=1e-6), (got, want, alpha, kw)

    # 1) multi-step streaming grid (4 blocks of 128 rows), alpha != 0
    a = jax.random.normal(k1, (512, 256), dtype=jnp.float32)
    b = jax.random.normal(k2, (512, 256), dtype=jnp.float32)
    check(a, b, 0.5, block_b=128)

    # 2) alpha == 0 path (penalty statically skipped, matching `if self.alpha:`)
    check(a, b, 0.0, block_b=128)

    # 3) ragged batch: last block is partial -> row-mask path (200 % 64 != 0)
    a3 = jax.random.normal(k3, (200, 128), dtype=jnp.float32)
    b3 = jax.random.normal(k4, (200, 128), dtype=jnp.float32)
    check(a3, b3, 0.3, block_b=64)

    # 4) bf16 inputs (halves HBM traffic; accumulation stays f32 inside the kernel)
    a4 = jax.random.normal(k5, (256, 128), dtype=jnp.float32).astype(jnp.bfloat16)
    b4 = jax.random.normal(k6, (256, 128), dtype=jnp.float32).astype(jnp.bfloat16)
    check(a4, b4, 1.0)

    # 5) tiny shape -> pure-JAX fallback path
    check(a3[:4, :8], b3[:4, :8], 0.5)

    print("KERNEL_OK")
</pallas_src>

<mosaic_0001>
module attributes {stable_mosaic.version = 11 : i64} {
  func.func @_custom_loss_kernel(%arg0: i32, %arg1: memref<128x256xf32, #tpu.memory_space<vmem>>, %arg2: memref<128x256xf32, #tpu.memory_space<vmem>>, %arg3: memref<1x8x128xf32, #tpu.memory_space<vmem>>) attributes {dimension_semantics = [#tpu.dimension_semantics<parallel>], iteration_bounds = array<i64: 4>, scalar_prefetch = 0 : i64, scratch_operands = 0 : i64, tpu.core_type = #tpu.core_type<tc>, window_params = [{transform_indices = @transform_0, window_bounds = array<i64: 128, 256>}, {transform_indices = @transform_1, window_bounds = array<i64: 128, 256>}, {transform_indices = @transform_2, window_bounds = array<i64: 1, 8, 128>}]} {
    %c0 = arith.constant 0 : index
    %c0_0 = arith.constant 0 : index
    %0 = vector.load %arg1[%c0, %c0_0] : memref<128x256xf32, #tpu.memory_space<vmem>>, vector<128x256xf32>
    %c0_1 = arith.constant 0 : index
    %c0_2 = arith.constant 0 : index
    %1 = vector.load %arg2[%c0_1, %c0_2] : memref<128x256xf32, #tpu.memory_space<vmem>>, vector<128x256xf32>
    %2 = arith.subf %0, %1 : vector<128x256xf32>
    %3 = arith.mulf %2, %2 : vector<128x256xf32>
    %c255_i32 = arith.constant 255 : i32
    %4 = tpu.dynamic_rotate %0 by %c255_i32 dim 1 : vector<128x256xf32>, i32 -> vector<128x256xf32>
    %c254_i32 = arith.constant 254 : i32
    %5 = tpu.dynamic_rotate %0 by %c254_i32 dim 1 : vector<128x256xf32>, i32 -> vector<128x256xf32>
    %6 = arith.addf %0, %5 : vector<128x256xf32>
    %cst = arith.constant 2.000000e+00 : f32
    %7 = vector.broadcast %cst : f32 to vector<128x256xf32>
    %8 = arith.mulf %7, %4 : vector<128x256xf32>
    %9 = arith.subf %6, %8 : vector<128x256xf32>
    %10 = tpu.iota {dimensions = array<i32: 1>} : vector<128x256xi32>
    %c254_i32_3 = arith.constant 254 : i32
    %11 = vector.broadcast %c254_i32_3 : i32 to vector<128x256xi32>
    %12 = arith.cmpi slt, %10, %11 : vector<128x256xi32>
    %13 = arith.mulf %9, %9 : vector<128x256xf32>
    %cst_4 = arith.constant 0.000000e+00 : f32
    %14 = vector.broadcast %cst_4 : f32 to vector<128x256xf32>
    %15 = arith.select %12, %13, %14 : vector<128x256xi1>, vector<128x256xf32>
    %cst_5 = arith.constant 5.039370e-01 : f32
    %16 = vector.broadcast %cst_5 : f32 to vector<128x256xf32>
    %17 = arith.mulf %16, %15 : vector<128x256xf32>
    %18 = arith.addf %3, %17 : vector<128x256xf32>
    %19 = vector.shape_cast %18 : vector<128x256xf32> to vector<1x128x256xf32>
    %cst_6 = arith.constant dense<0.000000e+00> : vector<1xf32>
    %20 = vector.multi_reduction <add>, %19, %cst_6 [1, 2] : vector<1x128x256xf32> to vector<1xf32>
    %21 = vector.shape_cast %20 : vector<1xf32> to vector<1x1x1xf32>
    %22 = vector.extract %21[0, 0, 0] : f32 from vector<1x1x1xf32>
    %23 = vector.broadcast %22 : f32 to vector<1x8x128xf32>
    %c0_7 = arith.constant 0 : index
    %c0_8 = arith.constant 0 : index
    %c0_9 = arith.constant 0 : index
    %24 = vector.load %arg3[%c0_7, %c0_8, %c0_9] : memref<1x8x128xf32, #tpu.memory_space<vmem>>, vector<1x8x128xf32>
    tpu.vector_store %arg3[%c0_7, %c0_8, %c0_9], %23 {strides = array<i32>} : memref<1x8x128xf32, #tpu.memory_space<vmem>>, vector<1x8x128xf32>,
    return
  }
  func.func @transform_0(%arg0: i32) -> (i32, i32) {
    %c0_i32 = arith.constant 0 : i32
    %c0_i32_0 = arith.constant 0 : i32
    return %arg0, %c0_i32 : i32, i32
  }
  func.func @transform_1(%arg0: i32) -> (i32, i32) {
    %c0_i32 = arith.constant 0 : i32
    %c0_i32_0 = arith.constant 0 : i32
    return %arg0, %c0_i32 : i32, i32
  }
  func.func @transform_2(%arg0: i32) -> (i32, i32, i32) {
    %c0_i32 = arith.constant 0 : i32
    %c0_i32_0 = arith.constant 0 : i32
    %c0_i32_1 = arith.constant 0 : i32
    return %arg0, %c0_i32, %c0_i32_0 : i32, i32, i32
  }
}

</mosaic_0001>

<bundles_post_ra>
// kernel: tpu_custom_call.1
= control target key start
LH: loop header
LB: loop body
LE: loop exit
PB: predicated region body
PF: predicated region fallthrough
CT: control target
= control target key end

     0   :  { %7 = vsyncpa [#allocation3], 0  ;;  %s1855_s0 = inlined_call_operand.hbm [shape: f32[512,256], index: 0, kind: input, shape index: {}]   ;;  %s1856_s1 = inlined_call_operand.hbm [shape: f32[512,256], index: 1, kind: input, shape index: {}]   ;;  %s1857_s2 = inlined_call_operand.hbm [shape: f32[4,8,128], index: 2, kind: output, shape index: {}]  }
   0x1   :  { %9 = vsyncpa [#allocation3 + $0x1], 0 }
   0x2   :  { %10 = vsyncpa [#allocation6], 0 }
   0x3   :  { %12 = vsyncpa [#allocation6 + $0x1], 0 }
   0x4   :  { %13 = vsyncpa [#allocation4], 0 }
   0x5   :  { %15 = vsyncpa [#allocation4 + $0x1], 0  ;;  %s1140_s9 = smov 0   ;;  %s1142_s10 = smov 0  }
   0x6   :  { %s1144_s11 = smov 0   ;;  %s1146_s12 = smov 0  }
   0x7 LB: > { %s1161_s13 = sadd.s32 4294967295, %s1116_s12   ;;  %s906_s14 = sadd.s32 4294967294, %s1116_s12   ;;  %s1116_s12 = sphi %s1146_s12, %s1872_s12   ;;  %s1112_s11 = sphi %s1144_s11, %s1871_s11   ;;  %s1108_s10 = sphi %s1142_s10, %s1870_s10   ;;  %s1104_s9 = sphi %s1140_s9, %s1869_s9  }
   0x8   : > { %s1165_s15 = sadd.s32 1, %s1116_s12   ;;  %s28_s16 = sadd.s32 1, %s1112_s11 }
   0x9   : > { %s25_s17 = ssub.s32 %s1116_s12, %s1165_s15  ;;  %p35_p0 = scmp.ne.s32.totalorder %s1112_s11, %s1108_s10 }
   0xa   : > { %p26_p1 = scmp.eq.s32.totalorder %s25_s17, 0  ;;  %p36_p2 = scmp.eq.s32.totalorder %s1116_s12, 0 }
   0xb   : > { %p41_p3 = scmp.ne.s32.totalorder %s1108_s10, %s1104_s9  ;;  %p42_p4 = scmp.eq.s32.totalorder %s1161_s13, 0 }
   0xc   : > { %s1177_s18 = scalar_select %p26_p1, %s1112_s11, %s28_s16  }
   0xd   : > { %p1179_p5 = por %p36_p2, %p35_p0  ;;  %p1183_p6 = por %p42_p4, %p41_p3 }
   0xe   : > { %p91_p7 = scmp.eq.s32.totalorder %s1161_s13, 3  ;;  %p97_p8 = scmp.eq.s32.totalorder %s906_s14, 3 }
   0xf   : > { %s1861_s20 = scalar_select %p1183_p6, 1, 0 }
  0x10   : > { %p948_p9 = scmp.lt.s32.totalorder %s1116_s12, 4  ;;  %p1189_p10 = por %p91_p7, %p35_p0 }
  0x11   : > { %p1193_p11 = por %p97_p8, %p41_p3  ;;  %s1198_s23 = sand.u32 1, %s1112_s11  }
  0x12   : > { %s1862_s21 = scalar_select %p1189_p10, 1, 0 }
  0x13   : > { %s1863_s22 = scalar_select %p1193_p11, 1, 0 }
  0x14   : > { %s926_s24 = sshll.u32 %s1116_s12, 12  ;;  %s909_s25 = sshll.u32 %s1198_s23, 8 }
  0x15   : > { %s1207_s28 = scalar_lea.hbm %s1855_s0, %s926_s24  ;;  %s121_s29 = scalar_lea.vmem [#allocation2], %s909_s25 }
  0x16   : > { %s129_s30 = sshll.u32 %s121_s29, 4  ;;  %p1213_p12 = pnand %p948_p9, %p1179_p5  ;;  %s1217_s30 = int_to_ptr.vmem [resolvable:$true] %s129_s30 }
  0x17   : > { %s118_s4 = scalar_lea.sflag [#allocation3], %s1198_s23  ;;  %s986_s5 = scalar_lea.hbm %s1207_s28, 4096 }
  0x18   : > { %p987_p13 = scmp.ne.s32.totalorder %s1207_s28, %s986_s5  ;;  %p988_p0 = pneg %p1213_p12 }
  0x19   : > { %s991_s8 = scalar_lea.hbm %s1855_s0, 16384  ;;  %p992_p3 = scmp.lt.u32.totalorder %s1207_s28, %s1855_s0 }
  0x1a   : > { %p989_p1 = pnand %p988_p0, %p987_p13  ;;  %p993_p4 = scmp.lt.u32.totalorder %s991_s8, %s986_s5 }
  0x1b   : > { %p995_p7 = scmp.lt.u32.totalorder %s986_s5, %s1207_s28 }
  0x1c   : > { %p990_p2 = pneg %p989_p1  ;;  %p994_p5 = por %p993_p4, %p992_p3 }
  0x1e   : > { %p996_p8 = por %p995_p7, %p994_p5 }
  0x20   : > { %p997_p9 = pnand %p996_p8, %p990_p2 }
  0x22   : > { %1000 = shalt.err (!%p997_p9)
}
  0x23   : > { %s1001_s17 = scalar_lea.vmem %s1217_s30, 4096  ;;  %s1118_s19 = smov [#allocation2]  }
  0x24   : > { %p1002_p13 = scmp.ne.s32.totalorder %s1217_s30, %s1001_s17  ;;  %s1006_s26 = sshll.u32 %s1118_s19, 4  ;;  %s1007_s26 = int_to_ptr.vmem [resolvable:$false] %s1006_s26 }
  0x25   : > { %s1008_s27 = scalar_lea.vmem %s1007_s26, 8192  ;;  %p1009_p10 = scmp.lt.s32.totalorder %s1217_s30, %s1007_s26 }
  0x26   : > { %p1004_p1 = pnand %p1002_p13, %p988_p0  ;;  %p1010_p3 = scmp.lt.s32.totalorder %s1008_s27, %s1001_s17 }
  0x28   : > { %p1005_p11 = pneg %p1004_p1  ;;  %p1011_p4 = por %p1010_p3, %p1009_p10 }
  0x2a   : > { %p1012_p5 = pnand %p1011_p4, %p1005_p11 }
  0x2c   : > { %1015 = shalt.err (!%p1012_p5)
}
  0x2d   : > { %s1119_s29 = smov 256   ;;  %s1120_s5 = smov 16  }
  0x2e   : > { %940 = dma.hbm_to_vmem [thread:$0]  (!%p1213_p12), %s1207_s28, 4096, %s1217_s30, %s118_s4, %s1119_s29, %s1119_s29, %s1120_s5  }
  0x2f   : > { %p917_p10 = scmp.ge.s32.totalorder %s1116_s12, 1  ;;  %p159_p11 = scmp.lt.s32.totalorder %s1116_s12, 5 }
  0x30   : > { %s1261_s14 = scalar_lea.hbm %s1856_s1, %s926_s24  ;;  %s143_s16 = scalar_lea.vmem [#allocation5], %s909_s25 }
  0x31   : > { %p1252_p2 = pnand %p917_p10, %p159_p11  ;;  %s151_s17 = sshll.u32 %s143_s16, 4  ;;  %s1265_s17 = int_to_ptr.vmem [resolvable:$true] %s151_s17 }
  0x32   : > { %s140_s28 = scalar_lea.sflag [#allocation6], %s1198_s23  ;;  %s1016_s30 = scalar_lea.hbm %s1261_s14, 4096 }
  0x33   : > { %p1017_p7 = scmp.ne.s32.totalorder %s1261_s14, %s1016_s30  ;;  %s1021_s24 = scalar_lea.hbm %s1856_s1, 16384 }
  0x34   : > { %p1022_p13 = scmp.lt.u32.totalorder %s1261_s14, %s1856_s1  ;;  %p1023_p1 = scmp.lt.u32.totalorder %s1021_s24, %s1016_s30 }
  0x35   : > { %p1019_p8 = pnand %p1017_p7, %p988_p0  ;;  %p1025_p4 = scmp.lt.u32.totalorder %s1016_s30, %s1261_s14 }
  0x36   : > { %p1024_p3 = por %p1023_p1, %p1022_p13 }
  0x37   : > { %p1020_p9 = pneg %p1019_p8 }
  0x38   : > { %p1026_p5 = por %p1025_p4, %p1024_p3 }
  0x3a   : > { %p1027_p10 = pnand %p1026_p5, %p1020_p9 }
  0x3c   : > { %1030 = shalt.err (!%p1027_p10)
}
  0x3d   : > { %s1031_s25 = scalar_lea.vmem %s1265_s17, 4096  ;;  %s1121_s7 = smov [#allocation5]  }
  0x3e   : > { %p1032_p11 = scmp.ne.s32.totalorder %s1265_s17, %s1031_s25  ;;  %s1036_s8 = sshll.u32 %s1121_s7, 4  ;;  %s1037_s8 = int_to_ptr.vmem [resolvable:$false] %s1036_s8 }
  0x3f   : > { %s1038_s16 = scalar_lea.vmem %s1037_s8, 8192  ;;  %p1039_p6 = scmp.lt.s32.totalorder %s1265_s17, %s1037_s8 }
  0x40   : > { %p1034_p7 = pnand %p1032_p11, %p988_p0  ;;  %p1040_p13 = scmp.lt.s32.totalorder %s1038_s16, %s1031_s25 }
  0x42   : > { %p1035_p8 = pneg %p1034_p7  ;;  %p1041_p1 = por %p1040_p13, %p1039_p6 }
  0x44   : > { %p1042_p3 = pnand %p1041_p1, %p1035_p8 }
  0x46   : > { %1045 = shalt.err (!%p1042_p3)
}
  0x47   : > { %943 = dma.hbm_to_vmem [thread:$0]  (!%p1213_p12), %s1261_s14, 4096, %s1265_s17, %s140_s28, %s1119_s29, %s1119_s29, %s1120_s5  }
  0x48   : > { %163 = sbr.rel (%p1252_p2) target bundleno = 556 (0x22c), region = 28  ;;  %s1299_s30 = sand.u32 (!%p1252_p2), 1, %s1108_s10  }
  0x49   : > { %s918_s4 = sshll.u32 (!%p1252_p2), %s1299_s30, 8  ;;  %s166_s19 = scalar_lea.sflag (!%p1252_p2), [#allocation3], %s1299_s30 }
  0x4a   : > { %s1303_s3 = scalar_lea.vmem (!%p1252_p2), [#allocation2], %s918_s4  ;;  %p1866_p6 = scmp.ne.s32.totalorder (!%p1252_p2), %s1861_s20, 0 }
  0x4f   : > { %1091 = dma.done.wait (%p1866_p6), %s166_s19, 4096  }
  0x50   : > { %1093 = vsyncadd (%p1866_p6), %s166_s19, 4294963200  ;;  %s175_s23 = scalar_lea.sflag [#allocation6], %s1299_s30  ;;  %s1310_s29 = scalar_lea.vmem [#allocation5], %s918_s4 }
  0x51   : > { %1095 = dma.done.wait (%p1866_p6), %s175_s23, 4096  }
  0x52   : > { %1097 = vsyncadd (%p1866_p6), %s175_s23, 4294963200  ;;  %v1317_v0 = vld [vmem:[%s1303_s3] sm:$0xff]  ;;  %s1122_s5 = smov 126   ;;  %s1123_s6 = smov 127   ;;  %v1324_v1 = vld [vmem:[%s1303_s3 + $0x8] sm:$0xff]  ;;  %v398_v28 = vlaneseq }
  0x53   : > { %433 = vrot.lane.b32.xlu1 %v1317_v0, %s1122_s5  ;;  %334 = vrot.lane.b32.xlu0 %v1317_v0, %s1123_s6  ;;  %v1331_v2 = vld [vmem:[%s1303_s3 + $0x18] sm:$0xff]  ;;  %v1334_v3 = vld [vmem:[%s1303_s3 + $0x10] sm:$0xff]  ;;  %s920_s20 = sshll.u32 %s1299_s30, 3  ;;  %s922_s28 = sshll.u32 %s1161_s13, 7 }
  0x54   : > { %v1345_v4 = vld [vmem:[%s1303_s3 + $0x28] sm:$0xff]  ;;  %v1348_v5 = vld [vmem:[%s1303_s3 + $0x20] sm:$0xff]  ;;  %v1359_v6 = vld [vmem:[%s1303_s3 + $0x38] sm:$0xff]  ;;  %v1522_v31 = vand.u32 127, %v398_v28  ;;  %s203_s14 = scalar_lea.vmem [#allocation7], %s920_s20  ;;  %s1814_s25 = scalar_lea.hbm %s1857_s2, %s922_s28 }
  0x55   : > { %v1362_v7 = vld [vmem:[%s1303_s3 + $0x30] sm:$0xff]  ;;  %v1373_v8 = vld [vmem:[%s1303_s3 + $0x48] sm:$0xff]  ;;  %v1376_v9 = vld [vmem:[%s1303_s3 + $0x40] sm:$0xff]  ;;  %s813_s17 = sshll.u32 %s203_s14, 4  ;;  %s800_s7 = scalar_lea.sflag [#allocation4], %s1299_s30  ;;  %s1809_s17 = int_to_ptr.vmem [resolvable:$true] %s813_s17 }
  0x56   : > { %v1387_v10 = vld [vmem:[%s1303_s3 + $0x58] sm:$0xff]  ;;  %v1390_v11 = vld [vmem:[%s1303_s3 + $0x50] sm:$0xff]  ;;  %v1401_v12 = vld [vmem:[%s1303_s3 + $0x68] sm:$0xff]  ;;  %vm497_vm0 = vcmp.lt.s32.totalorder %v1522_v31, 126  ;;  %vm400_vm1 = vcmp.lt.s32.totalorder %v1522_v31, 127  ;;  %v1540_v40 = vadd.s32 128, %v1522_v31 }
  0x57   : > { %465 = vrot.lane.b32.xlu1 %v1324_v1, %s1122_s5  ;;  %366 = vrot.lane.b32.xlu0 %v1324_v1, %s1123_s6  ;;  %v1404_v13 = vld [vmem:[%s1303_s3 + $0x60] sm:$0xff]  ;;  %v1415_v14 = vld [vmem:[%s1303_s3 + $0x78] sm:$0xff]  ;;  %s1046_s8 = scalar_lea.vmem %s1809_s17, 128  ;;  %p1867_p0 = scmp.ne.s32.totalorder %s1862_s21, 0 }
  0x58   : > { %v1418_v15 = vld [vmem:[%s1303_s3 + $0x70] sm:$0xff]  ;;  %v1429_v16 = vld [vmem:[%s1303_s3 + $0x88] sm:$0xff]  ;;  %v1432_v17 = vld [vmem:[%s1303_s3 + $0x80] sm:$0xff]  ;;  %vm628_vm2 = vcmp.lt.s32.totalorder %v1540_v40, 254  ;;  %p1047_p12 = scmp.ne.s32.totalorder %s1809_s17, %s1046_s8  ;;  %s1124_s13 = smov [#allocation7]  }
  0x59   : > { %v1443_v18 = vld [vmem:[%s1303_s3 + $0x98] sm:$0xff]  ;;  %v1446_v19 = vld [vmem:[%s1303_s3 + $0x90] sm:$0xff]  ;;  %v1457_v20 = vld [vmem:[%s1303_s3 + $0xa8] sm:$0xff]  ;;  %s1050_s16 = sshll.u32 %s1124_s13, 4  ;;  %s1051_s16 = int_to_ptr.vmem [resolvable:$false] %s1050_s16 }
  0x5a   : > { %v1460_v21 = vld [vmem:[%s1303_s3 + $0xa0] sm:$0xff]  ;;  %v1471_v22 = vld [vmem:[%s1303_s3 + $0xb8] sm:$0xff]  ;;  %v1474_v23 = vld [vmem:[%s1303_s3 + $0xb0] sm:$0xff]  ;;  %p1048_p2 = pnand %p1047_p12, %p1867_p0  ;;  %s1052_s4 = scalar_lea.vmem %s1051_s16, 256 }
  0x5b   : > { %368 = vrot.lane.b32.xlu1 %v1331_v2, %s1123_s6  ;;  %336 = vrot.lane.b32.xlu0 %v1334_v3, %s1123_s6  ;;  %v1485_v24 = vld [vmem:[%s1303_s3 + $0xc8] sm:$0xff]  ;;  %v1488_v25 = vld [vmem:[%s1303_s3 + $0xc0] sm:$0xff]  ;;  %p1053_p4 = scmp.lt.s32.totalorder %s1809_s17, %s1051_s16  ;;  %p1054_p5 = scmp.lt.s32.totalorder %s1052_s4, %s1046_s8 }
  0x5c   : > { %v1499_v26 = vld [vmem:[%s1303_s3 + $0xd8] sm:$0xff]  ;;  %v1502_v27 = vld [vmem:[%s1303_s3 + $0xd0] sm:$0xff]  ;;  %v1513_v29 = vld [vmem:[%s1303_s3 + $0xe8] sm:$0xff]  ;;  %p1049_p9 = pneg %p1048_p2 }
  0x5d   : > { %v1516_v30 = vld [vmem:[%s1303_s3 + $0xe0] sm:$0xff]  ;;  %v1532_v35 = vld [vmem:[%s1303_s3 + $0xf8] sm:$0xff]  ;;  %v1535_v36 = vld [vmem:[%s1303_s3 + $0xf0] sm:$0xff]  ;;  %p1055_p10 = por %p1054_p5, %p1053_p4 }
  0x5e   : > { %v238_v34 = vld [vmem:[%s1310_s29] sm:$0xff]  ;;  %v239_v38 = vld [vmem:[%s1310_s29 + $0x8] sm:$0xff] }
  0x5f   : > { %467 = vrot.lane.b32.xlu1 %v1331_v2, %s1122_s5  ;;  %435 = vrot.lane.b32.xlu0 %v1334_v3, %s1122_s5  ;;  %v270_v37 = vsub.f32 %v1317_v0, %v238_v34  ;;  %v271_v50 = vsub.f32 %v1324_v1, %v239_v38  ;;  %p1056_p11 = pnand %p1055_p10, %p1049_p9 }
  0x61   : > { %v302_v55 = vmul.f32 %v270_v37, %v270_v37  ;;  %v303_v58 = vmul.f32 %v271_v50, %v271_v50 }
  0x63   : > { %370 = vrot.lane.b32.xlu1 %v1345_v4, %s1123_s6  ;;  %338 = vrot.lane.b32.xlu0 %v1348_v5, %s1123_s6 }
  0x67   : > { %469 = vrot.lane.b32.xlu1 %v1345_v4, %s1122_s5  ;;  %437 = vrot.lane.b32.xlu0 %v1348_v5, %s1122_s5 }
  0x6b   : > { %372 = vrot.lane.b32.xlu1 %v1359_v6, %s1123_s6  ;;  %340 = vrot.lane.b32.xlu0 %v1362_v7, %s1123_s6 }
  0x6f   : > { %471 = vrot.lane.b32.xlu1 %v1359_v6, %s1122_s5  ;;  %439 = vrot.lane.b32.xlu0 %v1362_v7, %s1122_s5 }
  0x73   : > { %374 = vrot.lane.b32.xlu1 %v1373_v8, %s1123_s6  ;;  %342 = vrot.lane.b32.xlu0 %v1376_v9, %s1123_s6 }
  0x77   : > { %473 = vrot.lane.b32.xlu1 %v1373_v8, %s1122_s5  ;;  %441 = vrot.lane.b32.xlu0 %v1376_v9, %s1122_s5 }
  0x7b   : > { %376 = vrot.lane.b32.xlu1 %v1387_v10, %s1123_s6  ;;  %344 = vrot.lane.b32.xlu0 %v1390_v11, %s1123_s6 }
  0x7f   : > { %475 = vrot.lane.b32.xlu1 %v1387_v10, %s1122_s5  ;;  %443 = vrot.lane.b32.xlu0 %v1390_v11, %s1122_s5 }
  0x83   : > { %378 = vrot.lane.b32.xlu1 %v1401_v12, %s1123_s6  ;;  %346 = vrot.lane.b32.xlu0 %v1404_v13, %s1123_s6 }
  0x87   : > { %477 = vrot.lane.b32.xlu1 %v1401_v12, %s1122_s5  ;;  %445 = vrot.lane.b32.xlu0 %v1404_v13, %s1122_s5 }
  0x8b   : > { %380 = vrot.lane.b32.xlu1 %v1415_v14, %s1123_s6  ;;  %348 = vrot.lane.b32.xlu0 %v1418_v15, %s1123_s6 }
  0x8f   : > { %479 = vrot.lane.b32.xlu1 %v1415_v14, %s1122_s5  ;;  %447 = vrot.lane.b32.xlu0 %v1418_v15, %s1122_s5 }
  0x93   : > { %382 = vrot.lane.b32.xlu1 %v1429_v16, %s1123_s6  ;;  %350 = vrot.lane.b32.xlu0 %v1432_v17, %s1123_s6 }
  0x97   : > { %481 = vrot.lane.b32.xlu1 %v1429_v16, %s1122_s5  ;;  %449 = vrot.lane.b32.xlu0 %v1432_v17, %s1122_s5 }
  0x9b   : > { %384 = vrot.lane.b32.xlu1 %v1443_v18, %s1123_s6  ;;  %352 = vrot.lane.b32.xlu0 %v1446_v19, %s1123_s6 }
  0x9f   : > { %483 = vrot.lane.b32.xlu1 %v1443_v18, %s1122_s5  ;;  %451 = vrot.lane.b32.xlu0 %v1446_v19, %s1122_s5 }
  0xa3   : > { %386 = vrot.lane.b32.xlu1 %v1457_v20, %s1123_s6  ;;  %354 = vrot.lane.b32.xlu0 %v1460_v21, %s1123_s6 }
  0xa7   : > { %485 = vrot.lane.b32.xlu1 %v1457_v20, %s1122_s5  ;;  %453 = vrot.lane.b32.xlu0 %v1460_v21, %s1122_s5 }
  0xab   : > { %388 = vrot.lane.b32.xlu1 %v1471_v22, %s1123_s6  ;;  %356 = vrot.lane.b32.xlu0 %v1474_v23, %s1123_s6 }
  0xaf   : > { %487 = vrot.lane.b32.xlu1 %v1471_v22, %s1122_s5  ;;  %455 = vrot.lane.b32.xlu0 %v1474_v23, %s1122_s5 }
  0xb3   : > { %390 = vrot.lane.b32.xlu1 %v1485_v24, %s1123_s6  ;;  %358 = vrot.lane.b32.xlu0 %v1488_v25, %s1123_s6 }
  0xb7   : > { %489 = vrot.lane.b32.xlu1 %v1485_v24, %s1122_s5  ;;  %457 = vrot.lane.b32.xlu0 %v1488_v25, %s1122_s5 }
  0xbb   : > { %392 = vrot.lane.b32.xlu1 %v1499_v26, %s1123_s6  ;;  %360 = vrot.lane.b32.xlu0 %v1502_v27, %s1123_s6 }
  0xbf   : > { %491 = vrot.lane.b32.xlu1 %v1499_v26, %s1122_s5  ;;  %459 = vrot.lane.b32.xlu0 %v1502_v27, %s1122_s5 }
  0xc3   : > { %394 = vrot.lane.b32.xlu1 %v1513_v29, %s1123_s6  ;;  %362 = vrot.lane.b32.xlu0 %v1516_v30, %s1123_s6 }
  0xc5   : > { %v434_v32 = vpop.permute.xlu1 %433  ;;  %v335_v33 = vpop.permute.xlu0 %334 }
  0xc7   : > { %493 = vrot.lane.b32.xlu1 %v1513_v29, %s1122_s5  ;;  %461 = vrot.lane.b32.xlu0 %v1516_v30, %s1122_s5 }
  0xc9   : > { %v466_v39 = vpop.permute.xlu1 %465  ;;  %v367_v41 = vpop.permute.xlu0 %366 }
  0xca   : > { %v498_v42 = vsel %vm497_vm0, %v434_v32, %v466_v39  ;;  %v514_v43 = vsel %vm497_vm0, %v466_v39, %v434_v32  ;;  %v401_v44 = vsel %vm400_vm1, %v335_v33, %v367_v41  ;;  %v417_v45 = vsel %vm400_vm1, %v367_v41, %v335_v33 }
  0xcb   : > { %v530_v46 = vadd.f32 %v498_v42, %v1317_v0  ;;  %v531_v47 = vadd.f32 %v514_v43, %v1324_v1  ;;  %v562_v48 = vmul.f32 2.0, %v401_v44  ;;  %v563_v49 = vmul.f32 2.0, %v417_v45  ;;  %396 = vrot.lane.b32.xlu1 %v1532_v35, %s1123_s6  ;;  %364 = vrot.lane.b32.xlu0 %v1535_v36, %s1123_s6 }
  0xcd   : > { %v594_v51 = vsub.f32 %v530_v46, %v562_v48  ;;  %v595_v52 = vsub.f32 %v531_v47, %v563_v49  ;;  %v369_v53 = vpop.permute.xlu1 %368  ;;  %v337_v54 = vpop.permute.xlu0 %336 }
  0xce   : > { %v402_v41 = vsel %vm400_vm1, %v337_v54, %v369_v53  ;;  %v418_v42 = vsel %vm400_vm1, %v369_v53, %v337_v54 }
  0xcf   : > { %v629_v56 = vmul.f32 %v594_v51, %v594_v51  ;;  %v630_v57 = vmul.f32 %v595_v52, %v595_v52  ;;  %495 = vrot.lane.b32.xlu1 %v1532_v35, %s1122_s5  ;;  %463 = vrot.lane.b32.xlu0 %v1535_v36, %s1122_s5  ;;  %v564_v47 = vmul.f32 2.0, %v402_v41  ;;  %v565_v48 = vmul.f32 2.0, %v418_v42  ;;  %v240_v51 = vld [vmem:[%s1310_s29 + $0x10] sm:$0xff] }
  0xd1   : > { %v662_v59 = vsel %vm628_vm2, %v630_v57, 0.0  ;;  %v693_v60 = vmul.f32 0.503937, %v629_v56  ;;  %v468_v61 = vpop.permute.xlu1 %467  ;;  %v436_v62 = vpop.permute.xlu0 %435 }
  0xd2   : > { %v694_v63 = vmul.f32 0.503937, %v662_v59  ;;  %v499_v38 = vsel %vm497_vm0, %v436_v62, %v468_v61  ;;  %v515_v39 = vsel %vm497_vm0, %v468_v61, %v436_v62  ;;  %v272_v59 = vsub.f32 %v1334_v3, %v240_v51 }
  0xd3   : > { %v725_v0 = vadd.f32 %v693_v60, %v302_v55  ;;  %v532_v45 = vadd.f32 %v499_v38, %v1334_v3  ;;  %v533_v46 = vadd.f32 %v515_v39, %v1331_v2 }
  0xd4   : > { %v726_v1 = vadd.f32 %v694_v63, %v303_v58  ;;  %v241_v58 = vld [vmem:[%s1310_s29 + $0x18] sm:$0xff]  ;;  %v304_v3 = vmul.f32 %v272_v59, %v272_v59 }
  0xd5   : > { %v371_v28 = vpop.permute.xlu1 %370  ;;  %v339_v32 = vpop.permute.xlu0 %338  ;;  %v596_v52 = vsub.f32 %v532_v45, %v564_v47  ;;  %v597_v55 = vsub.f32 %v533_v46, %v565_v48  ;;  %v273_v39 = vsub.f32 %v1331_v2, %v241_v58 }
  0xd6   : > { %v1564_v33 = vadd.f32 %v726_v1, %v725_v0  ;;  %v403_v54 = vsel %vm400_vm1, %v339_v32, %v371_v28  ;;  %v419_v57 = vsel %vm400_vm1, %v371_v28, %v339_v32  ;;  %v242_v32 = vld [vmem:[%s1310_s29 + $0x20] sm:$0xff] }
  0xd7   : > { %v631_v0 = vmul.f32 %v596_v52, %v596_v52  ;;  %v632_v1 = vmul.f32 %v597_v55, %v597_v55  ;;  %v566_v38 = vmul.f32 2.0, %v403_v54  ;;  %v305_v52 = vmul.f32 %v273_v39, %v273_v39  ;;  %v244_v54 = vld [vmem:[%s1310_s29 + $0x30] sm:$0xff] }
  0xd8   : > { %v274_v55 = vsub.f32 %v1348_v5, %v242_v32 }
  0xd9   : > { %v470_v34 = vpop.permute.xlu1 %469  ;;  %v438_v37 = vpop.permute.xlu0 %437  ;;  %v664_v48 = vsel %vm628_vm2, %v632_v1, 0.0  ;;  %v695_v51 = vmul.f32 0.503937, %v631_v0 }
  0xda   : > { %v500_v56 = vsel %vm497_vm0, %v438_v37, %v470_v34  ;;  %v516_v53 = vsel %vm497_vm0, %v470_v34, %v438_v37  ;;  %v567_v34 = vmul.f32 2.0, %v419_v57  ;;  %v696_v57 = vmul.f32 0.503937, %v664_v48 }
  0xdb   : > { %v534_v60 = vadd.f32 %v500_v56, %v1348_v5  ;;  %v535_v61 = vadd.f32 %v516_v53, %v1345_v4  ;;  %v243_v53 = vld [vmem:[%s1310_s29 + $0x28] sm:$0xff]  ;;  %v727_v1 = vadd.f32 %v695_v51, %v304_v3  ;;  %v276_v5 = vsub.f32 %v1362_v7, %v244_v54 }
  0xdc   : > { %v728_v32 = vadd.f32 %v696_v57, %v305_v52 }
  0xdd   : > { %v373_v43 = vpop.permute.xlu1 %372  ;;  %v341_v44 = vpop.permute.xlu0 %340  ;;  %v598_v41 = vsub.f32 %v534_v60, %v566_v38  ;;  %v599_v42 = vsub.f32 %v535_v61, %v567_v34  ;;  %v275_v34 = vsub.f32 %v1345_v4, %v243_v53  ;;  %v758_v51 = vadd.f32 %v1564_v33, %v727_v1 }
  0xde   : > { %v420_v45 = vsel %vm400_vm1, %v373_v43, %v341_v44  ;;  %v404_v2 = vsel %vm400_vm1, %v341_v44, %v373_v43 }
  0xdf   : > { %v569_v56 = vmul.f32 2.0, %v420_v45  ;;  %v633_v58 = vmul.f32 %v598_v41, %v598_v41  ;;  %v634_v59 = vmul.f32 %v599_v42, %v599_v42  ;;  %v568_v60 = vmul.f32 2.0, %v404_v2 }
  0xe1   : > { %v472_v49 = vpop.permute.xlu1 %471  ;;  %v440_v50 = vpop.permute.xlu0 %439  ;;  %v666_v41 = vsel %vm628_vm2, %v634_v59, 0.0  ;;  %v697_v42 = vmul.f32 0.503937, %v633_v58  ;;  %v246_v58 = vld [vmem:[%s1310_s29 + $0x40] sm:$0xff]  ;;  %v759_v59 = vadd.f32 %v758_v51, %v728_v32 }
  0xe2   : > { %v517_v37 = vsel %vm497_vm0, %v472_v49, %v440_v50  ;;  %v501_v28 = vsel %vm497_vm0, %v440_v50, %v472_v49  ;;  %v698_v52 = vmul.f32 0.503937, %v666_v41 }
  0xe3   : > { %v537_v49 = vadd.f32 %v517_v37, %v1359_v6  ;;  %v536_v50 = vadd.f32 %v501_v28, %v1362_v7  ;;  %v306_v37 = vmul.f32 %v274_v55, %v274_v55  ;;  %v245_v28 = vld [vmem:[%s1310_s29 + $0x38] sm:$0xff] }
  0xe5   : > { %v375_v62 = vpop.permute.xlu1 %374  ;;  %v343_v63 = vpop.permute.xlu0 %342  ;;  %v601_v38 = vsub.f32 %v537_v49, %v569_v56  ;;  %v600_v43 = vsub.f32 %v536_v50, %v568_v60  ;;  %v307_v49 = vmul.f32 %v275_v34, %v275_v34  ;;  %v277_v50 = vsub.f32 %v1359_v6, %v245_v28 }
  0xe6   : > { %v405_v3 = vsel %vm400_vm1, %v343_v63, %v375_v62  ;;  %v421_v7 = vsel %vm400_vm1, %v375_v62, %v343_v63  ;;  %v729_v56 = vadd.f32 %v697_v42, %v306_v37  ;;  %v308_v63 = vmul.f32 %v276_v5, %v276_v5 }
  0xe7   : > { %v636_v4 = vmul.f32 %v601_v38, %v601_v38  ;;  %v570_v55 = vmul.f32 2.0, %v405_v3  ;;  %v571_v53 = vmul.f32 2.0, %v421_v7  ;;  %v309_v5 = vmul.f32 %v277_v50, %v277_v50  ;;  %v247_v3 = vld [vmem:[%s1310_s29 + $0x48] sm:$0xff] }
  0xe8   : > { %v730_v28 = vadd.f32 %v698_v52, %v307_v49  ;;  %v760_v32 = vadd.f32 %v759_v59, %v729_v56 }
  0xe9   : > { %v474_v46 = vpop.permute.xlu1 %473  ;;  %v442_v47 = vpop.permute.xlu0 %441  ;;  %v668_v6 = vsel %vm628_vm2, %v636_v4, 0.0 }
  0xea   : > { %v502_v44 = vsel %vm497_vm0, %v442_v47, %v474_v46  ;;  %v518_v39 = vsel %vm497_vm0, %v474_v46, %v442_v47  ;;  %v635_v47 = vmul.f32 %v600_v43, %v600_v43  ;;  %v761_v50 = vadd.f32 %v760_v32, %v730_v28 }
  0xeb   : > { %v538_v46 = vadd.f32 %v502_v44, %v1376_v9  ;;  %v539_v2 = vadd.f32 %v518_v39, %v1373_v8  ;;  %v278_v39 = vsub.f32 %v1376_v9, %v246_v58  ;;  %v279_v9 = vsub.f32 %v1373_v8, %v247_v3 }
  0xec   : > { %v699_v1 = vmul.f32 0.503937, %v635_v47 }
  0xed   : > { %v377_v61 = vpop.permute.xlu1 %376  ;;  %v345_v0 = vpop.permute.xlu0 %344  ;;  %v602_v60 = vsub.f32 %v538_v46, %v570_v55  ;;  %v603_v38 = vsub.f32 %v539_v2, %v571_v53  ;;  %v310_v53 = vmul.f32 %v278_v39, %v278_v39 }
  0xee   : > { %v406_v43 = vsel %vm400_vm1, %v345_v0, %v377_v61  ;;  %v422_v44 = vsel %vm400_vm1, %v377_v61, %v345_v0  ;;  %v731_v46 = vadd.f32 %v699_v1, %v308_v63 }
  0xef   : > { %v637_v51 = vmul.f32 %v602_v60, %v602_v60  ;;  %v572_v4 = vmul.f32 2.0, %v406_v43  ;;  %v573_v7 = vmul.f32 2.0, %v422_v44  ;;  %v638_v61 = vmul.f32 %v603_v38, %v603_v38 }
  0xf0   : > { %v762_v59 = vadd.f32 %v761_v50, %v731_v46  ;;  %v311_v43 = vmul.f32 %v279_v9, %v279_v9  ;;  %v252_v9 = vld [vmem:[%s1310_s29 + $0x70] sm:$0xff] }
  0xf1   : > { %v476_v45 = vpop.permute.xlu1 %475  ;;  %v444_v48 = vpop.permute.xlu0 %443  ;;  %v701_v63 = vmul.f32 0.503937, %v637_v51 }
  0xf2   : > { %v503_v33 = vsel %vm497_vm0, %v444_v48, %v476_v45  ;;  %v519_v54 = vsel %vm497_vm0, %v476_v45, %v444_v48  ;;  %v248_v45 = vld [vmem:[%s1310_s29 + $0x50] sm:$0xff]  ;;  %v700_v48 = vmul.f32 0.503937, %v668_v6  ;;  %v670_v6 = vsel %vm628_vm2, %v638_v61, 0.0 }
  0xf3   : > { %v540_v34 = vadd.f32 %v503_v33, %v1390_v11  ;;  %v541_v37 = vadd.f32 %v519_v54, %v1387_v10  ;;  %v280_v49 = vsub.f32 %v1390_v11, %v248_v45  ;;  %v249_v33 = vld [vmem:[%s1310_s29 + $0x58] sm:$0xff]  ;;  %v702_v39 = vmul.f32 0.503937, %v670_v6  ;;  %v250_v45 = vld [vmem:[%s1310_s29 + $0x60] sm:$0xff] }
  0xf4   : > { %v732_v54 = vadd.f32 %v700_v48, %v309_v5  ;;  %v281_v44 = vsub.f32 %v1387_v10, %v249_v33  ;;  %v733_v28 = vadd.f32 %v701_v63, %v310_v53  ;;  %v282_v53 = vsub.f32 %v1404_v13, %v250_v45 }
  0xf5   : > { %v379_v57 = vpop.permute.xlu1 %378  ;;  %v347_v62 = vpop.permute.xlu0 %346  ;;  %v604_v0 = vsub.f32 %v540_v34, %v572_v4  ;;  %v605_v47 = vsub.f32 %v541_v37, %v573_v7 }
  0xf6   : > { %v407_v58 = vsel %vm400_vm1, %v347_v62, %v379_v57  ;;  %v423_v8 = vsel %vm400_vm1, %v379_v57, %v347_v62  ;;  %v312_v62 = vmul.f32 %v280_v49, %v280_v49  ;;  %v734_v49 = vadd.f32 %v702_v39, %v311_v43 }
  0xf7   : > { %v639_v60 = vmul.f32 %v604_v0, %v604_v0  ;;  %v640_v1 = vmul.f32 %v605_v47, %v605_v47  ;;  %v574_v34 = vmul.f32 2.0, %v407_v58  ;;  %v575_v32 = vmul.f32 2.0, %v423_v8 }
  0xf8   : > { %v313_v47 = vmul.f32 %v281_v44, %v281_v44  ;;  %v314_v44 = vmul.f32 %v282_v53, %v282_v53 }
  0xf9   : > { %v478_v41 = vpop.permute.xlu1 %477  ;;  %v446_v42 = vpop.permute.xlu0 %445  ;;  %v672_v10 = vsel %vm628_vm2, %v640_v1, 0.0  ;;  %v703_v48 = vmul.f32 0.503937, %v639_v60 }
  0xfa   : > { %v504_v2 = vsel %vm497_vm0, %v446_v42, %v478_v41  ;;  %v520_v52 = vsel %vm497_vm0, %v478_v41, %v446_v42  ;;  %v763_v41 = vadd.f32 %v762_v59, %v732_v54  ;;  %v704_v33 = vmul.f32 0.503937, %v672_v10 }
  0xfb   : > { %v542_v11 = vadd.f32 %v504_v2, %v1404_v13  ;;  %v543_v38 = vadd.f32 %v520_v52, %v1401_v12  ;;  %v251_v2 = vld [vmem:[%s1310_s29 + $0x68] sm:$0xff]  ;;  %v735_v58 = vadd.f32 %v703_v48, %v312_v62 }
  0xfc   : > { %v764_v50 = vadd.f32 %v763_v41, %v733_v28 }
  0xfd   : > { %v381_v55 = vpop.permute.xlu1 %380  ;;  %v349_v56 = vpop.permute.xlu0 %348  ;;  %v606_v42 = vsub.f32 %v542_v11, %v574_v34  ;;  %v607_v51 = vsub.f32 %v543_v38, %v575_v32  ;;  %v736_v34 = vadd.f32 %v704_v33, %v313_v47  ;;  %v253_v32 = vld [vmem:[%s1310_s29 + $0x78] sm:$0xff] }
  0xfe   : > { %v408_v4 = vsel %vm400_vm1, %v349_v56, %v381_v55  ;;  %v424_v7 = vsel %vm400_vm1, %v381_v55, %v349_v56  ;;  %v283_v55 = vsub.f32 %v1401_v12, %v251_v2  ;;  %v284_v56 = vsub.f32 %v1418_v15, %v252_v9 }
  0xff   : > { %v641_v54 = vmul.f32 %v606_v42, %v606_v42  ;;  %v576_v63 = vmul.f32 2.0, %v408_v4  ;;  %v642_v59 = vmul.f32 %v607_v51, %v607_v51  ;;  %v577_v6 = vmul.f32 2.0, %v424_v7 }
 0x100   : > { %v765_v1 = vadd.f32 %v764_v50, %v734_v49  ;;  %v315_v10 = vmul.f32 %v283_v55, %v283_v55  ;;  %v285_v7 = vsub.f32 %v1415_v14, %v253_v32  ;;  %v255_v55 = vld [vmem:[%s1310_s29 + $0x88] sm:$0xff] }
 0x101   : > { %v480_v37 = vpop.permute.xlu1 %479  ;;  %v448_v5 = vpop.permute.xlu0 %447 }
 0x102   : > { %v505_v57 = vsel %vm497_vm0, %v448_v5, %v480_v37  ;;  %v521_v3 = vsel %vm497_vm0, %v480_v37, %v448_v5  ;;  %v705_v37 = vmul.f32 0.503937, %v641_v54  ;;  %v766_v5 = vadd.f32 %v765_v1, %v735_v58 }
 0x103   : > { %v544_v46 = vadd.f32 %v505_v57, %v1418_v15  ;;  %v545_v52 = vadd.f32 %v521_v3, %v1415_v14  ;;  %v674_v15 = vsel %vm628_vm2, %v642_v59, 0.0  ;;  %v317_v1 = vmul.f32 %v285_v7, %v285_v7 }
 0x104   : > { %v706_v48 = vmul.f32 0.503937, %v674_v15  ;;  %v737_v51 = vadd.f32 %v705_v37, %v314_v44  ;;  %v767_v47 = vadd.f32 %v766_v5, %v736_v34  ;;  %v256_v37 = vld [vmem:[%s1310_s29 + $0x90] sm:$0xff]  ;;  %v287_v15 = vsub.f32 %v1429_v16, %v255_v55 }
 0x105   : > { %v383_v61 = vpop.permute.xlu1 %382  ;;  %v351_v0 = vpop.permute.xlu0 %350  ;;  %v608_v8 = vsub.f32 %v544_v46, %v576_v63  ;;  %v609_v38 = vsub.f32 %v545_v52, %v577_v6  ;;  %v316_v46 = vmul.f32 %v284_v56, %v284_v56 }
 0x106   : > { %v409_v12 = vsel %vm400_vm1, %v351_v0, %v383_v61  ;;  %v425_v39 = vsel %vm400_vm1, %v383_v61, %v351_v0  ;;  %v254_v0 = vld [vmem:[%s1310_s29 + $0x80] sm:$0xff]  ;;  %v738_v63 = vadd.f32 %v706_v48, %v315_v10  ;;  %v768_v58 = vadd.f32 %v767_v47, %v737_v51 }
 0x107   : > { %v643_v57 = vmul.f32 %v608_v8, %v608_v8  ;;  %v644_v3 = vmul.f32 %v609_v38, %v609_v38  ;;  %v578_v45 = vmul.f32 2.0, %v409_v12  ;;  %v579_v4 = vmul.f32 2.0, %v425_v39 }
 0x108   : > { %v286_v56 = vsub.f32 %v1432_v17, %v254_v0  ;;  %v769_v39 = vadd.f32 %v768_v58, %v738_v63  ;;  %v319_v0 = vmul.f32 %v287_v15, %v287_v15  ;;  %v259_v63 = vld [vmem:[%s1310_s29 + $0xa8] sm:$0xff] }
 0x109   : > { %v482_v11 = vpop.permute.xlu1 %481  ;;  %v450_v60 = vpop.permute.xlu0 %449  ;;  %v707_v2 = vmul.f32 0.503937, %v643_v57  ;;  %v676_v33 = vsel %vm628_vm2, %v644_v3, 0.0 }
 0x10a   : > { %v506_v43 = vsel %vm497_vm0, %v450_v60, %v482_v11  ;;  %v522_v13 = vsel %vm497_vm0, %v482_v11, %v450_v60  ;;  %v708_v38 = vmul.f32 0.503937, %v676_v33 }
 0x10b   : > { %v546_v28 = vadd.f32 %v506_v43, %v1432_v17  ;;  %v547_v62 = vadd.f32 %v522_v13, %v1429_v16  ;;  %v739_v43 = vadd.f32 %v707_v2, %v316_v46  ;;  %v257_v16 = vld [vmem:[%s1310_s29 + $0x98] sm:$0xff]  ;;  %v258_v2 = vld [vmem:[%s1310_s29 + $0xa0] sm:$0xff] }
 0x10d   : > { %v385_v41 = vpop.permute.xlu1 %384  ;;  %v353_v42 = vpop.permute.xlu0 %352  ;;  %v610_v61 = vsub.f32 %v546_v28, %v578_v45  ;;  %v611_v9 = vsub.f32 %v547_v62, %v579_v4  ;;  %v318_v28 = vmul.f32 %v286_v56, %v286_v56  ;;  %v288_v62 = vsub.f32 %v1446_v19, %v256_v37 }
 0x10e   : > { %v410_v49 = vsel %vm400_vm1, %v353_v42, %v385_v41  ;;  %v426_v50 = vsel %vm400_vm1, %v385_v41, %v353_v42  ;;  %v740_v41 = vadd.f32 %v708_v38, %v317_v1  ;;  %v770_v42 = vadd.f32 %v769_v39, %v739_v43 }
 0x10f   : > { %v645_v8 = vmul.f32 %v610_v61, %v610_v61  ;;  %v580_v11 = vmul.f32 2.0, %v410_v49  ;;  %v581_v60 = vmul.f32 2.0, %v426_v50  ;;  %v646_v13 = vmul.f32 %v611_v9, %v611_v9 }
 0x110   : > { %v289_v50 = vsub.f32 %v1443_v18, %v257_v16  ;;  %v771_v58 = vadd.f32 %v770_v42, %v740_v41  ;;  %v291_v1 = vsub.f32 %v1457_v20, %v259_v63 }
 0x111   : > { %v484_v52 = vpop.permute.xlu1 %483  ;;  %v452_v53 = vpop.permute.xlu0 %451  ;;  %v709_v32 = vmul.f32 0.503937, %v645_v8  ;;  %v678_v3 = vsel %vm628_vm2, %v646_v13, 0.0 }
 0x112   : > { %v507_v14 = vsel %vm497_vm0, %v452_v53, %v484_v52  ;;  %v523_v54 = vsel %vm497_vm0, %v484_v52, %v452_v53  ;;  %v710_v9 = vmul.f32 0.503937, %v678_v3 }
 0x113   : > { %v548_v59 = vadd.f32 %v507_v14, %v1446_v19  ;;  %v549_v6 = vadd.f32 %v523_v54, %v1443_v18  ;;  %v741_v49 = vadd.f32 %v709_v32, %v318_v28  ;;  %v320_v54 = vmul.f32 %v288_v62, %v288_v62  ;;  %v260_v32 = vld [vmem:[%s1310_s29 + $0xb0] sm:$0xff] }
 0x114   : > { %v742_v56 = vadd.f32 %v710_v9, %v319_v0 }
 0x115   : > { %v387_v44 = vpop.permute.xlu1 %386  ;;  %v355_v34 = vpop.permute.xlu0 %354  ;;  %v612_v12 = vsub.f32 %v548_v59, %v580_v11  ;;  %v613_v5 = vsub.f32 %v549_v6, %v581_v60  ;;  %v290_v6 = vsub.f32 %v1460_v21, %v258_v2  ;;  %v772_v8 = vadd.f32 %v771_v58, %v741_v49 }
 0x116   : > { %v411_v17 = vsel %vm400_vm1, %v355_v34, %v387_v44  ;;  %v427_v57 = vsel %vm400_vm1, %v387_v44, %v355_v34  ;;  %v321_v60 = vmul.f32 %v289_v50, %v289_v50 }
 0x117   : > { %v647_v48 = vmul.f32 %v612_v12, %v612_v12  ;;  %v648_v51 = vmul.f32 %v613_v5, %v613_v5  ;;  %v582_v46 = vmul.f32 2.0, %v411_v17  ;;  %v583_v19 = vmul.f32 2.0, %v427_v57 }
 0x118   : > { %v773_v17 = vadd.f32 %v772_v8, %v742_v56 }
 0x119   : > { %v486_v45 = vpop.permute.xlu1 %485  ;;  %v454_v10 = vpop.permute.xlu0 %453  ;;  %v711_v59 = vmul.f32 0.503937, %v647_v48  ;;  %v680_v55 = vsel %vm628_vm2, %v648_v51, 0.0  ;;  %v323_v48 = vmul.f32 %v291_v1, %v291_v1  ;;  %v261_v51 = vld [vmem:[%s1310_s29 + $0xb8] sm:$0xff] }
 0x11a   : > { %v508_v4 = vsel %vm497_vm0, %v454_v10, %v486_v45  ;;  %v524_v7 = vsel %vm497_vm0, %v486_v45, %v454_v10  ;;  %v293_v50 = vsub.f32 %v1471_v22, %v261_v51 }
 0x11b   : > { %v550_v47 = vadd.f32 %v508_v4, %v1460_v21  ;;  %v551_v61 = vadd.f32 %v524_v7, %v1457_v20  ;;  %v712_v21 = vmul.f32 0.503937, %v680_v55  ;;  %v743_v34 = vadd.f32 %v711_v59, %v320_v54  ;;  %v263_v59 = vld [vmem:[%s1310_s29 + $0xc8] sm:$0xff] }
 0x11c   : > { %v322_v20 = vmul.f32 %v290_v6, %v290_v6  ;;  %v292_v4 = vsub.f32 %v1474_v23, %v260_v32 }
 0x11d   : > { %v614_v52 = vsub.f32 %v550_v47, %v582_v46  ;;  %v615_v53 = vsub.f32 %v551_v61, %v583_v19  ;;  %v389_v33 = vpop.permute.xlu1 %388  ;;  %v357_v14 = vpop.permute.xlu0 %356  ;;  %v744_v10 = vadd.f32 %v712_v21, %v321_v60  ;;  %v774_v16 = vadd.f32 %v773_v17, %v743_v34  ;;  %v262_v61 = vld [vmem:[%s1310_s29 + $0xc0] sm:$0xff] }
 0x11e   : > { %v412_v11 = vsel %vm400_vm1, %v357_v14, %v389_v33  ;;  %v428_v18 = vsel %vm400_vm1, %v389_v33, %v357_v14  ;;  %v324_v58 = vmul.f32 %v292_v4, %v292_v4  ;;  %v294_v6 = vsub.f32 %v1488_v25, %v262_v61 }
 0x11f   : > { %v649_v38 = vmul.f32 %v614_v52, %v614_v52  ;;  %v650_v43 = vmul.f32 %v615_v53, %v615_v53  ;;  %v584_v5 = vmul.f32 2.0, %v412_v11  ;;  %v585_v15 = vmul.f32 2.0, %v428_v18 }
 0x120   : > { %v775_v52 = vadd.f32 %v774_v16, %v744_v10  ;;  %v265_v16 = vld [vmem:[%s1310_s29 + $0xd8] sm:$0xff] }
 0x121   : > { %v488_v13 = vpop.permute.xlu1 %487  ;;  %v456_v44 = vpop.permute.xlu0 %455  ;;  %v682_v57 = vsel %vm628_vm2, %v650_v43, 0.0  ;;  %v713_v62 = vmul.f32 0.503937, %v649_v38  ;;  %v325_v38 = vmul.f32 %v293_v50, %v293_v50  ;;  %v295_v43 = vsub.f32 %v1485_v24, %v263_v59 }
 0x122   : > { %v509_v37 = vsel %vm497_vm0, %v456_v44, %v488_v13  ;;  %v525_v12 = vsel %vm497_vm0, %v488_v13, %v456_v44  ;;  %v714_v7 = vmul.f32 0.503937, %v682_v57 }
 0x123   : > { %v552_v39 = vadd.f32 %v509_v37, %v1474_v23  ;;  %v553_v28 = vadd.f32 %v525_v12, %v1471_v22  ;;  %v745_v0 = vadd.f32 %v713_v62, %v322_v20  ;;  %v326_v12 = vmul.f32 %v294_v6, %v294_v6 }
 0x124   : > { %v746_v55 = vadd.f32 %v714_v7, %v323_v48 }
 0x125   : > { %v616_v41 = vsub.f32 %v552_v39, %v584_v5  ;;  %v617_v42 = vsub.f32 %v553_v28, %v585_v15  ;;  %v391_v3 = vpop.permute.xlu1 %390  ;;  %v359_v45 = vpop.permute.xlu0 %358  ;;  %v776_v22 = vadd.f32 %v775_v52, %v745_v0  ;;  %v264_v28 = vld [vmem:[%s1310_s29 + $0xd0] sm:$0xff] }
 0x126   : > { %v413_v19 = vsel %vm400_vm1, %v359_v45, %v391_v3  ;;  %v429_v47 = vsel %vm400_vm1, %v391_v3, %v359_v45  ;;  %v327_v3 = vmul.f32 %v295_v43, %v295_v43  ;;  %v296_v48 = vsub.f32 %v1502_v27, %v264_v28 }
 0x127   : > { %v651_v46 = vmul.f32 %v616_v41, %v616_v41  ;;  %v652_v2 = vmul.f32 %v617_v42, %v617_v42  ;;  %v586_v33 = vmul.f32 2.0, %v413_v19  ;;  %v587_v14 = vmul.f32 2.0, %v429_v47  ;;  %v266_v47 = vld [vmem:[%s1310_s29 + $0xe0] sm:$0xff] }
 0x128   : > { %v777_v5 = vadd.f32 %v776_v22, %v746_v55 }
 0x129   : > { %v490_v9 = vpop.permute.xlu1 %489  ;;  %v458_v49 = vpop.permute.xlu0 %457  ;;  %v715_v56 = vmul.f32 0.503937, %v651_v46  ;;  %v684_v8 = vsel %vm628_vm2, %v652_v2, 0.0 }
 0x12a   : > { %v510_v23 = vsel %vm497_vm0, %v458_v49, %v490_v9  ;;  %v526_v53 = vsel %vm497_vm0, %v490_v9, %v458_v49  ;;  %v716_v21 = vmul.f32 0.503937, %v684_v8  ;;  %v297_v9 = vsub.f32 %v1499_v26, %v265_v16 }
 0x12b   : > { %v554_v54 = vadd.f32 %v510_v23, %v1488_v25  ;;  %v555_v63 = vadd.f32 %v526_v53, %v1485_v24  ;;  %v747_v34 = vadd.f32 %v715_v56, %v324_v58  ;;  %v328_v23 = vmul.f32 %v296_v48, %v296_v48 }
 0x12c   : > { %v748_v45 = vadd.f32 %v716_v21, %v325_v38  ;;  %v298_v53 = vsub.f32 %v1516_v30, %v266_v47 }
 0x12d   : > { %v618_v11 = vsub.f32 %v554_v54, %v586_v33  ;;  %v619_v18 = vsub.f32 %v555_v63, %v587_v14  ;;  %v393_v60 = vpop.permute.xlu1 %392  ;;  %v361_v1 = vpop.permute.xlu0 %360  ;;  %v778_v10 = vadd.f32 %v777_v5, %v747_v34 }
 0x12e   : > { %v414_v25 = vsel %vm400_vm1, %v361_v1, %v393_v60  ;;  %v430_v37 = vsel %vm400_vm1, %v393_v60, %v361_v1  ;;  %v268_v60 = vld [vmem:[%s1310_s29 + $0xf0] sm:$0xff]  ;;  %v330_v34 = vmul.f32 %v298_v53, %v298_v53 }
 0x12f   : > { %v653_v13 = vmul.f32 %v618_v11, %v618_v11  ;;  %v654_v44 = vmul.f32 %v619_v18, %v619_v18  ;;  %v588_v57 = vmul.f32 2.0, %v414_v25  ;;  %v589_v62 = vmul.f32 2.0, %v430_v37 }
 0x130   : > { %v779_v49 = vadd.f32 %v778_v10, %v748_v45  ;;  %v329_v11 = vmul.f32 %v297_v9, %v297_v9 }
 0x131   : > { %v492_v15 = vpop.permute.xlu1 %491  ;;  %v460_v39 = vpop.permute.xlu0 %459  ;;  %v686_v20 = vsel %vm628_vm2, %v654_v44, 0.0  ;;  %v717_v24 = vmul.f32 0.503937, %v653_v13 }
 0x132   : > { %v511_v32 = vsel %vm497_vm0, %v460_v39, %v492_v15  ;;  %v527_v17 = vsel %vm497_vm0, %v492_v15, %v460_v39  ;;  %v718_v51 = vmul.f32 0.503937, %v686_v20 }
 0x133   : > { %v556_v41 = vadd.f32 %v511_v32, %v1502_v27  ;;  %v557_v42 = vadd.f32 %v527_v17, %v1499_v26  ;;  %v749_v61 = vadd.f32 %v717_v24, %v326_v12  ;;  %v267_v27 = vld [vmem:[%s1310_s29 + $0xe8] sm:$0xff] }
 0x134   : > { %v750_v33 = vadd.f32 %v718_v51, %v327_v3  ;;  %v299_v18 = vsub.f32 %v1513_v29, %v267_v27 }
 0x135   : > { %v620_v4 = vsub.f32 %v556_v41, %v588_v57  ;;  %v621_v7 = vsub.f32 %v557_v42, %v589_v62  ;;  %v395_v46 = vpop.permute.xlu1 %394  ;;  %v363_v19 = vpop.permute.xlu0 %362  ;;  %v780_v58 = vadd.f32 %v779_v49, %v749_v61  ;;  %v269_v57 = vld [vmem:[%s1310_s29 + $0xf8] sm:$0xff] }
 0x136   : > { %v415_v50 = vsel %vm400_vm1, %v363_v19, %v395_v46  ;;  %v431_v52 = vsel %vm400_vm1, %v395_v46, %v363_v19  ;;  %v331_v15 = vmul.f32 %v299_v18, %v299_v18  ;;  %v301_v51 = vsub.f32 %v1532_v35, %v269_v57 }
 0x137   : > { %v655_v0 = vmul.f32 %v620_v4, %v620_v4  ;;  %v656_v2 = vmul.f32 %v621_v7, %v621_v7  ;;  %v590_v55 = vmul.f32 2.0, %v415_v50  ;;  %v591_v56 = vmul.f32 2.0, %v431_v52 }
 0x138   : > { %v781_v25 = vadd.f32 %v780_v58, %v750_v33  ;;  %v333_v9 = vmul.f32 %v301_v51, %v301_v51 }
 0x139   : > { %v719_v14 = vmul.f32 0.503937, %v655_v0  ;;  %v494_v54 = vpop.permute.xlu1 %493  ;;  %v462_v63 = vpop.permute.xlu0 %461  ;;  %v688_v26 = vsel %vm628_vm2, %v656_v2, 0.0 }
 0x13a   : > { %v512_v59 = vsel %vm497_vm0, %v462_v63, %v494_v54  ;;  %v528_v6 = vsel %vm497_vm0, %v494_v54, %v462_v63  ;;  %v720_v1 = vmul.f32 0.503937, %v688_v26 }
 0x13b   : > { %v558_v22 = vadd.f32 %v512_v59, %v1516_v30  ;;  %v559_v8 = vadd.f32 %v528_v6, %v1513_v29  ;;  %v751_v38 = vadd.f32 %v719_v14, %v328_v23  ;;  %v300_v29 = vsub.f32 %v1535_v36, %v268_v60 }
 0x13c   : > { %v752_v39 = vadd.f32 %v720_v1, %v329_v11 }
 0x13d   : > { %v622_v43 = vsub.f32 %v558_v22, %v590_v55  ;;  %v623_v13 = vsub.f32 %v559_v8, %v591_v56  ;;  %v397_v44 = vpop.permute.xlu1 %396  ;;  %v365_v21 = vpop.permute.xlu0 %364  ;;  %v782_v28 = vadd.f32 %v781_v25, %v751_v38  ;;  %v332_v19 = vmul.f32 %v300_v29, %v300_v29 }
 0x13e   : > { %v416_v30 = vsel %vm400_vm1, %v365_v21, %v397_v44  ;;  %v432_v5 = vsel %vm400_vm1, %v397_v44, %v365_v21 }
 0x13f   : > { %v657_v37 = vmul.f32 %v622_v43, %v622_v43  ;;  %v658_v12 = vmul.f32 %v623_v13, %v623_v13  ;;  %v592_v62 = vmul.f32 2.0, %v416_v30  ;;  %v593_v41 = vmul.f32 2.0, %v432_v5 }
 0x140   : > { %v783_v46 = vadd.f32 %v782_v28, %v752_v39 }
 0x141   : > { %v690_v20 = vsel %vm628_vm2, %v658_v12, 0.0  ;;  %v721_v24 = vmul.f32 0.503937, %v657_v37  ;;  %v496_v32 = vpop.permute.xlu1 %495  ;;  %v464_v17 = vpop.permute.xlu0 %463 }
 0x142   : > { %v513_v42 = vsel %vm497_vm0, %v464_v17, %v496_v32  ;;  %v529_v3 = vsel %vm497_vm0, %v496_v32, %v464_v17  ;;  %v722_v45 = vmul.f32 0.503937, %v690_v20 }
 0x143   : > { %v753_v10 = vadd.f32 %v721_v24, %v330_v34  ;;  %v560_v16 = vadd.f32 %v513_v42, %v1535_v36  ;;  %v561_v48 = vadd.f32 %v529_v3, %v1532_v35 }
 0x144   : > { %v754_v0 = vadd.f32 %v722_v45, %v331_v15 }
 0x145   : > { %v624_v4 = vsub.f32 %v560_v16, %v592_v62  ;;  %v625_v7 = vsub.f32 %v561_v48, %v593_v41  ;;  %v784_v2 = vadd.f32 %v783_v46, %v753_v10 }
 0x147   : > { %v659_v47 = vmul.f32 %v624_v4, %v624_v4  ;;  %v660_v61 = vmul.f32 %v625_v7, %v625_v7  ;;  %v785_v52 = vadd.f32 %v784_v2, %v754_v0 }
 0x149   : > { %v723_v49 = vmul.f32 0.503937, %v659_v47  ;;  %v692_v31 = vsel %vm628_vm2, %v660_v61, 0.0 }
 0x14a   : > { %v724_v50 = vmul.f32 0.503937, %v692_v31 }
 0x14b   : > { %v755_v36 = vadd.f32 %v723_v49, %v332_v19 }
 0x14c   : > { %v756_v23 = vadd.f32 %v724_v50, %v333_v9 }
 0x14d   : > { %v786_v35 = vadd.f32 %v785_v52, %v755_v36 }
 0x14f   : > { %v787_v27 = vadd.f32 %v786_v35, %v756_v23 }
 0x151   : > { %788 = vadd.xlane.f32.xlu0 %v787_v27 }
 0x1de   : > { %v789_v53 = vpop.xlane.xlu0 %788 }
 0x1df   : > { %v790_v33 = vrot.slane %v789_v53, 4 }
 0x1e1   : > { %v791_v14 = vadd.f32 %v790_v33, %v789_v53 }
 0x1e3   : > { %v792_v54 = vrot.slane %v791_v14, 2 }
 0x1e5   : > { %v793_v63 = vadd.f32 %v792_v54, %v791_v14 }
 0x1e7   : > { %v794_v58 = vrot.slane %v793_v63, 1 }
 0x1e9   : > { %v795_v26 = vadd.f32 %v794_v58, %v793_v63 }
 0x1eb   : > { %929 = vpush %v795_v26 }
 0x21c   : > { %s930_s24 = spop %929 }
 0x21d   : > { %v797_v40 = vstv %s930_s24 }
 0x21e   : > { %798 = vst [vmem:[%s203_s14] sm:$0xff] %v797_v40 }
 0x21f   : > { %1059 = shalt.err (!%p1056_p11)
}
 0x220   : > { %s1060_s30 = scalar_lea.hbm %s1814_s25, 128  ;;  %s1064_s23 = scalar_lea.hbm %s1857_s2, 512 }
 0x221   : > { %p1061_p7 = scmp.ne.s32.totalorder %s1814_s25, %s1060_s30  ;;  %p1065_p1 = scmp.lt.u32.totalorder %s1814_s25, %s1857_s2 }
 0x222   : > { %p1066_p3 = scmp.lt.u32.totalorder %s1064_s23, %s1060_s30  ;;  %p1068_p12 = scmp.lt.u32.totalorder %s1060_s30, %s1814_s25 }
 0x223   : > { %p1062_p8 = pnand %p1061_p7, %p1867_p0 }
 0x224   : > { %p1067_p6 = por %p1066_p3, %p1065_p1 }
 0x225   : > { %p1063_p13 = pneg %p1062_p8 }
 0x226   : > { %p1069_p2 = por %p1068_p12, %p1067_p6 }
 0x228   : > { %p1070_p9 = pnand %p1069_p2, %p1063_p13 }
 0x22a   : > { %1073 = shalt.err (!%p1070_p9)
}
 0x22b   : > { %935 = dma.vmem_to_hbm [thread:$0]  (%p1867_p0), %s1809_s17, 128, %s1814_s25, %s800_s7  }
 0x22c PF: > { %p949_p4 = scmp.ge.s32.totalorder %s1116_s12, 2  ;;  %s825_s6 = sand.u32 1, %s1104_s9  }
 0x22d   : > { %p1868_p5 = scmp.ne.s32.totalorder %s1863_s22, 0  ;;  %s826_s20 = scalar_lea.sflag [#allocation4], %s825_s6 }
 0x22f   : > { %p945_p10 = pnand %p949_p4, %p1868_p5 }
 0x231   : > { %1099 = dma.done.wait (!%p945_p10), %s826_s20, 128  }
 0x232   : > { %1101 = vsyncadd (!%p945_p10), %s826_s20, 4294967168  ;;  %p18_p11 = scmp.ge.s32.totalorder %s1165_s15, 6   ;;  %s1869_s9 = smov %s1108_s10 }
 0x233   : > { %s1870_s10 = smov %s1112_s11  ;;  %s1871_s11 = smov %s1177_s18 }
 0x234   : > { %s1872_s12 = smov %s1165_s15  ;;  %20 = sbr.rel (!%p18_p11) target bundleno = 7 (0x7), region = 86 }
 0x23b   :  { %831 = vsyncpa [#allocation3], 1 }
 0x23c   :  { %833 = vsyncpa [#allocation3 + $0x1], 1 }
 0x23d   :  { %834 = vsyncpa [#allocation6], 1 }
 0x23e   :  { %836 = vsyncpa [#allocation6 + $0x1], 1 }
 0x23f   :  { %837 = vsyncpa [#allocation4], 1 }
 0x240   :  { %839 = vsyncpa [#allocation4 + $0x1], 1 }

</bundles_post_ra>
